<compile_context>
chip_gen: v6e
topology: v6e:2x2x1
jax: 0.10.0
libtpu: 0.0.40
codegen_flags: <defaults>
</compile_context>

<pallas_src>
import functools

import jax
import jax.numpy as jnp
from jax.experimental import pallas as pl
from jax.experimental.pallas import tpu as pltpu

N_NODE = 128       # self.nNode in MLPPolicy
_SUBLANE = 16      # bf16 sublane packing: keep batch tiles a multiple of 16


# ---------------------------------------------------------------------------
# Device introspection (safe fallbacks; perf-only decisions)
# ---------------------------------------------------------------------------
def _device_kind():
    try:
        return jax.devices()[0].device_kind.lower()
    except Exception:  # pragma: no cover - interpret mode / no device
        return ""


def _tensorcores_per_chip():
    # v7x has 2 TensorCores per chip; v5e/v6e have 1.
    kind = _device_kind()
    return 2 if ("v7" in kind or "7x" in kind) else 1


def _act_dtype():
    # bf16 VPU/EUP exists on v6e/v7x (faster tanh, half vreg pressure).
    # Keep f32 activations on v5e and older (no bf16 VPU/EUP) and as fallback.
    kind = _device_kind()
    if any(tag in kind for tag in ("v6", "6e", "v7", "7x")):
        return jnp.bfloat16
    return jnp.float32


# ---------------------------------------------------------------------------
# Kernel
# ---------------------------------------------------------------------------
def _policy_kernel(x_ref, w1_ref, b1_ref, w2_ref, b2_ref, hc_ref, ha_ref,
                   *, act_dtype):
    """Fused actor+critic 2-layer MLP (one batch tile).

    x_ref : (TB, num_inputs) bf16 tile of the batch
    w1_ref: (num_inputs, 256) bf16   -- [actor_l1 | critic_l1] concatenated
    b1_ref: (1, 256) f32
    w2_ref: (256, 256) bf16          -- block-diagonal [[Wa2, 0], [0, Wc2]]
    b2_ref: (1, 256) f32             -- [ba2 | bc2]
    hc_ref/ha_ref: (TB, 128) outputs (critic hidden, actor hidden)
    """
    # Layer 1: both branches in one 256-wide MXU pass (bf16 in, f32 accumulate).
    h1 = jnp.dot(x_ref[...], w1_ref[...], preferred_element_type=jnp.float32)
    h1 = (h1 + b1_ref[...]).astype(act_dtype)          # f32 bias-add, then cast
    h1 = jnp.tanh(h1).astype(jnp.bfloat16)              # bf16 operand for MXU

    # Layer 2: single 256-wide block-diagonal matmul (native MXU tile on v6e/v7x).
    h2 = jnp.dot(h1, w2_ref[...], preferred_element_type=jnp.float32)
    h2 = jnp.tanh((h2 + b2_ref[...]).astype(act_dtype))

    # Lane-aligned split of the 256-wide result into the two 128-lane outputs.
    ha_ref[...] = h2[:, :N_NODE].astype(ha_ref.dtype)   # actor hidden
    hc_ref[...] = h2[:, N_NODE:].astype(hc_ref.dtype)   # critic hidden


def _fused_policy_call(x, w1c, b1c, w2c, b2c, tb, grid_n, act_dtype, out_dtype):
    """x: (Bp, num_inputs) bf16 with Bp == tb * grid_n.

    Returns (hidden_critic, hidden_actor), each (Bp, 128) in out_dtype."""
    Bp, num_inputs = x.shape

    kernel = functools.partial(_policy_kernel, act_dtype=act_dtype)

    x_spec = pl.BlockSpec((tb, num_inputs), lambda i: (i, 0))
    out_spec = pl.BlockSpec((tb, N_NODE), lambda i: (i, 0))

    def resident(arr):
        # Constant block index -> stays VMEM-resident across batch tiles.
        return pl.BlockSpec(arr.shape, lambda i: (0, 0))

    out_bytes = jnp.dtype(out_dtype).itemsize
    cost = pl.CostEstimate(
        flops=2 * Bp * (num_inputs * 2 * N_NODE + (2 * N_NODE) * (2 * N_NODE)),
        transcendentals=Bp * 4 * N_NODE,                       # two 256-wide tanh
        bytes_accessed=(x.size * 2
                        + w1c.size * 2 + w2c.size * 2
                        + b1c.size * 4 + b2c.size * 4
                        + 2 * Bp * N_NODE * out_bytes),
    )

    out_shapes = (
        jax.ShapeDtypeStruct((Bp, N_NODE), out_dtype),  # hidden_critic
        jax.ShapeDtypeStruct((Bp, N_NODE), out_dtype),  # hidden_actor
    )
    return pl.pallas_call(
        kernel,
        out_shape=out_shapes,
        grid=(grid_n,),
        in_specs=[
            x_spec,
            resident(w1c), resident(b1c),
            resident(w2c), resident(b2c),
        ],
        out_specs=(out_spec, out_spec),
        compiler_params=pltpu.CompilerParams(
            dimension_semantics=("parallel",),   # batch tiles are independent
        ),
        cost_estimate=cost,
    )(x, w1c, b1c, w2c, b2c)


# ---------------------------------------------------------------------------
# Parameters (matches PyTorch weights_init_mlp)
# ---------------------------------------------------------------------------
def init_linear_params(key, in_features, out_features):
    """weight ~ N(0,1), each output-neuron row normalized to unit L2 norm over
    the input dim, bias = 0. Returned weight is transposed to (in, out)."""
    w = jax.random.normal(key, (out_features, in_features), dtype=jnp.float32)
    w = w / jnp.sqrt(jnp.sum(w * w, axis=1, keepdims=True))
    b = jnp.zeros((1, out_features), dtype=jnp.float32)
    return w.T, b  # (in, out), (1, out)


def make_mlp_policy_params(num_inputs, seed=0):
    """Full-precision (f32) parameters, PyTorch-equivalent layout."""
    key = jax.random.PRNGKey(seed)
    ka1, ka2, kc1, kc2 = jax.random.split(key, 4)
    return {
        "actor": {
            "l1": init_linear_params(ka1, num_inputs, N_NODE),
            "l2": init_linear_params(ka2, N_NODE, N_NODE),
        },
        "critic": {
            "l1": init_linear_params(kc1, num_inputs, N_NODE),
            "l2": init_linear_params(kc2, N_NODE, N_NODE),
        },
    }
    # NOTE: critic_linear and self.dist are only used by act()/get_value(),
    # not by forward(); forward() is what we implement here.


def pack_policy_params(params):
    """Pack f32 params into the fused kernel layout (done once, offline).

    Layer-1 actor/critic weights are concatenated along the output dim
    ((num_inputs, 256)); layer-2 weights are packed block-diagonally into a
    single (256, 256) matrix. Weights are bf16 (MXU operands), biases f32.
    """
    aw1, ab1 = params["actor"]["l1"]
    aw2, ab2 = params["actor"]["l2"]
    cw1, cb1 = params["critic"]["l1"]
    cw2, cb2 = params["critic"]["l2"]

    w1c = jnp.concatenate([aw1, cw1], axis=1).astype(jnp.bfloat16)  # (in, 256)
    b1c = jnp.concatenate([ab1, cb1], axis=1).astype(jnp.float32)   # (1, 256)

    zeros = jnp.zeros((N_NODE, N_NODE), dtype=jnp.float32)
    w2c = jnp.block([[aw2, zeros], [zeros, cw2]]).astype(jnp.bfloat16)  # (256,256)
    b2c = jnp.concatenate([ab2, cb2], axis=1).astype(jnp.float32)       # (1, 256)

    return {"layer1": (w1c, b1c), "layer2": (w2c, b2c)}


# ---------------------------------------------------------------------------
# Forward (MLPPolicy.forward with hook=False)
# ---------------------------------------------------------------------------
def _round_up(n, m):
    return ((n + m - 1) // m) * m


def _select_tiling(batch, tile_b):
    """Pick (tb, grid_n, padded_batch) so padding is < 16 rows per tile and,
    on multi-TensorCore chips (v7x), the grid has >= 2 tiles when possible."""
    grid_n = max(1, pl.cdiv(batch, tile_b))
    if _tensorcores_per_chip() > 1 and grid_n < 2 and batch >= 2 * _SUBLANE:
        grid_n = 2                      # feed both TensorCores on v7x
    tb = _round_up(pl.cdiv(batch, grid_n), _SUBLANE)
    return tb, grid_n, tb * grid_n


def mlp_policy_forward(packed_params, inputs, states, masks,
                       tile_b=2048, out_dtype=jnp.bfloat16):
    """Returns (hidden_critic_list, hidden_actor_list, states).

    out_dtype defaults to bf16 (output writeback dominates HBM traffic);
    pass out_dtype=jnp.float32 to exactly mirror the PyTorch dtype.
    """
    # TODO(synk): hook=True per-layer activation-recording path not implemented.
    w1c, b1c = packed_params["layer1"]
    w2c, b2c = packed_params["layer2"]

    B = inputs.shape[0]
    tb, grid_n, Bp = _select_tiling(B, tile_b)

    x = inputs.astype(jnp.bfloat16)          # MXU operand dtype; halves x traffic
    if Bp != B:
        x = jnp.pad(x, ((0, Bp - B), (0, 0)))

    hidden_critic, hidden_actor = _fused_policy_call(
        x, w1c, b1c, w2c, b2c, tb, grid_n, _act_dtype(), out_dtype)

    if Bp != B:
        hidden_critic = hidden_critic[:B]
        hidden_actor = hidden_actor[:B]
    return [hidden_critic], [hidden_actor], states


# ---------------------------------------------------------------------------
# Self-test
# ---------------------------------------------------------------------------
if __name__ == "__main__":
    num_inputs = 16
    batch = 8

    key = jax.random.PRNGKey(0)
    kx, ks = jax.random.split(key)
    x = jax.random.normal(kx, (batch, num_inputs), dtype=jnp.float32)
    states = jnp.zeros((batch, 1), dtype=jnp.float32)   # state_size == 1
    masks = jnp.ones((batch, 1), dtype=jnp.float32)     # ignored by forward()

    params_f32 = make_mlp_policy_params(num_inputs, seed=0)
    packed = pack_policy_params(params_f32)

    hidden_critic_list, hidden_actor_list, states_out = mlp_policy_forward(
        packed, x, states, masks
    )
    jax.block_until_ready(hidden_critic_list[-1])
    jax.block_until_ready(hidden_actor_list[-1])

    # sanity check against pure-JAX f32 reference (bf16 MXU path -> loose tol)
    def ref_mlp(x, w1, b1, w2, b2):
        return jnp.tanh(jnp.tanh(x @ w1 + b1) @ w2 + b2)

    ref_actor = ref_mlp(x, *params_f32["actor"]["l1"], *params_f32["actor"]["l2"])
    ref_critic = ref_mlp(x, *params_f32["critic"]["l1"], *params_f32["critic"]["l2"])

    got_actor = hidden_actor_list[-1].astype(jnp.float32)
    got_critic = hidden_critic_list[-1].astype(jnp.float32)

    assert got_actor.shape == (batch, N_NODE)
    assert got_critic.shape == (batch, N_NODE)
    assert states_out.shape == states.shape
    assert jnp.allclose(got_actor, ref_actor, atol=3e-2, rtol=3e-2)
    assert jnp.allclose(got_critic, ref_critic, atol=3e-2, rtol=3e-2)

    print("KERNEL_OK")
</pallas_src>

<mosaic_0001>
module attributes {stable_mosaic.version = 11 : i64} {
  func.func @_policy_kernel(%arg0: i32, %arg1: memref<16x16xbf16, #tpu.memory_space<vmem>>, %arg2: memref<16x256xbf16, #tpu.memory_space<vmem>>, %arg3: memref<1x256xf32, #tpu.memory_space<vmem>>, %arg4: memref<256x256xbf16, #tpu.memory_space<vmem>>, %arg5: memref<1x256xf32, #tpu.memory_space<vmem>>, %arg6: memref<16x128xbf16, #tpu.memory_space<vmem>>, %arg7: memref<16x128xbf16, #tpu.memory_space<vmem>>) attributes {dimension_semantics = [#tpu.dimension_semantics<parallel>], iteration_bounds = array<i64: 1>, scalar_prefetch = 0 : i64, scratch_operands = 0 : i64, tpu.core_type = #tpu.core_type<tc>, window_params = [{transform_indices = @transform_0, window_bounds = array<i64: 16, 16>}, {pipeline_mode = #tpu.pipeline_mode<synchronous>, transform_indices = @transform_1, window_bounds = array<i64: 16, 256>}, {pipeline_mode = #tpu.pipeline_mode<synchronous>, transform_indices = @transform_2, window_bounds = array<i64: 1, 256>}, {pipeline_mode = #tpu.pipeline_mode<synchronous>, transform_indices = @transform_3, window_bounds = array<i64: 256, 256>}, {pipeline_mode = #tpu.pipeline_mode<synchronous>, transform_indices = @transform_4, window_bounds = array<i64: 1, 256>}, {transform_indices = @transform_5, window_bounds = array<i64: 16, 128>}, {transform_indices = @transform_6, window_bounds = array<i64: 16, 128>}]} {
    %c0 = arith.constant 0 : index
    %c0_0 = arith.constant 0 : index
    %0 = vector.load %arg1[%c0, %c0_0] : memref<16x16xbf16, #tpu.memory_space<vmem>>, vector<16x16xbf16>
    %c0_1 = arith.constant 0 : index
    %c0_2 = arith.constant 0 : index
    %1 = vector.load %arg2[%c0_1, %c0_2] : memref<16x256xbf16, #tpu.memory_space<vmem>>, vector<16x256xbf16>
    %cst = arith.constant dense<0.000000e+00> : vector<16x256xf32>
    %2 = tpu.matmul %0, %1, %cst {dimension_numbers = #tpu.dot_dimension_numbers<[1], [0], [0], [1], [0, 0, 1, 1], [], []>} : vector<16x16xbf16>, vector<16x256xbf16>, vector<16x256xf32> -> vector<16x256xf32>
    %c0_3 = arith.constant 0 : index
    %c0_4 = arith.constant 0 : index
    %3 = vector.load %arg3[%c0_3, %c0_4] : memref<1x256xf32, #tpu.memory_space<vmem>>, vector<1x256xf32>
    %4 = vector.broadcast %3 : vector<1x256xf32> to vector<16x256xf32>
    %5 = arith.addf %2, %4 : vector<16x256xf32>
    %6 = math.tanh %5 : vector<16x256xf32>
    %7 = arith.truncf %6 : vector<16x256xf32> to vector<16x256xbf16>
    %c0_5 = arith.constant 0 : index
    %c0_6 = arith.constant 0 : index
    %8 = vector.load %arg4[%c0_5, %c0_6] : memref<256x256xbf16, #tpu.memory_space<vmem>>, vector<256x256xbf16>
    %cst_7 = arith.constant dense<0.000000e+00> : vector<16x256xf32>
    %9 = tpu.matmul %7, %8, %cst_7 {dimension_numbers = #tpu.dot_dimension_numbers<[1], [0], [0], [1], [0, 0, 1, 1], [], []>} : vector<16x256xbf16>, vector<256x256xbf16>, vector<16x256xf32> -> vector<16x256xf32>
    %c0_8 = arith.constant 0 : index
    %c0_9 = arith.constant 0 : index
    %10 = vector.load %arg5[%c0_8, %c0_9] : memref<1x256xf32, #tpu.memory_space<vmem>>, vector<1x256xf32>
    %11 = vector.broadcast %10 : vector<1x256xf32> to vector<16x256xf32>
    %12 = arith.addf %9, %11 : vector<16x256xf32>
    %13 = math.tanh %12 : vector<16x256xf32>
    %14 = vector.extract_strided_slice %13 {offsets = [0, 0], sizes = [16, 128], strides = [1, 1]} : vector<16x256xf32> to vector<16x128xf32>
    %15 = arith.truncf %14 : vector<16x128xf32> to vector<16x128xbf16>
    %c0_10 = arith.constant 0 : index
    %c0_11 = arith.constant 0 : index
    %16 = vector.load %arg7[%c0_10, %c0_11] : memref<16x128xbf16, #tpu.memory_space<vmem>>, vector<16x128xbf16>
    tpu.vector_store %arg7[%c0_10, %c0_11], %15 {strides = array<i32>} : memref<16x128xbf16, #tpu.memory_space<vmem>>, vector<16x128xbf16>,
    %17 = vector.extract_strided_slice %13 {offsets = [0, 128], sizes = [16, 128], strides = [1, 1]} : vector<16x256xf32> to vector<16x128xf32>
    %18 = arith.truncf %17 : vector<16x128xf32> to vector<16x128xbf16>
    %c0_12 = arith.constant 0 : index
    %c0_13 = arith.constant 0 : index
    %19 = vector.load %arg6[%c0_12, %c0_13] : memref<16x128xbf16, #tpu.memory_space<vmem>>, vector<16x128xbf16>
    tpu.vector_store %arg6[%c0_12, %c0_13], %18 {strides = array<i32>} : memref<16x128xbf16, #tpu.memory_space<vmem>>, vector<16x128xbf16>,
    return
  }
  func.func @transform_0(%arg0: i32) -> (i32, i32) {
    %c0_i32 = arith.constant 0 : i32
    %c0_i32_0 = arith.constant 0 : i32
    return %arg0, %c0_i32 : i32, i32
  }
  func.func @transform_1(%arg0: i32) -> (i32, i32) {
    %c0_i32 = arith.constant 0 : i32
    %c0_i32_0 = arith.constant 0 : i32
    %c0_i32_1 = arith.constant 0 : i32
    return %c0_i32, %c0_i32_0 : i32, i32
  }
  func.func @transform_2(%arg0: i32) -> (i32, i32) {
    %c0_i32 = arith.constant 0 : i32
    %c0_i32_0 = arith.constant 0 : i32
    %c0_i32_1 = arith.constant 0 : i32
    return %c0_i32, %c0_i32_0 : i32, i32
  }
  func.func @transform_3(%arg0: i32) -> (i32, i32) {
    %c0_i32 = arith.constant 0 : i32
    %c0_i32_0 = arith.constant 0 : i32
    %c0_i32_1 = arith.constant 0 : i32
    return %c0_i32, %c0_i32_0 : i32, i32
  }
  func.func @transform_4(%arg0: i32) -> (i32, i32) {
    %c0_i32 = arith.constant 0 : i32
    %c0_i32_0 = arith.constant 0 : i32
    %c0_i32_1 = arith.constant 0 : i32
    return %c0_i32, %c0_i32_0 : i32, i32
  }
  func.func @transform_5(%arg0: i32) -> (i32, i32) {
    %c0_i32 = arith.constant 0 : i32
    %c0_i32_0 = arith.constant 0 : i32
    return %arg0, %c0_i32 : i32, i32
  }
  func.func @transform_6(%arg0: i32) -> (i32, i32) {
    %c0_i32 = arith.constant 0 : i32
    %c0_i32_0 = arith.constant 0 : i32
    return %arg0, %c0_i32 : i32, i32
  }
}

</mosaic_0001>

<bundles_post_ra>
// kernel: tpu_custom_call.1
= control target key start
LH: loop header
LB: loop body
LE: loop exit
PB: predicated region body
PF: predicated region fallthrough
CT: control target
= control target key end

     0   :  { %12 = vsyncpa [#allocation3], 0  ;;  %s770_s0 = inlined_call_operand.hbm [shape: bf16[16,16], index: 0, kind: input, shape index: {}]   ;;  %s771_s1 = inlined_call_operand.hbm [shape: bf16[16,256], index: 1, kind: input, shape index: {}]   ;;  %s772_s2 = inlined_call_operand.vmem [shape: f32[1,256], index: 2, kind: input, shape index: {}]   ;;  %s773_s3 = inlined_call_operand.hbm [shape: bf16[256,256], index: 3, kind: input, shape index: {}]   ;;  %s774_s4 = inlined_call_operand.vmem [shape: f32[1,256], index: 4, kind: input, shape index: {}]   ;;  %s775_s5 = inlined_call_operand.hbm [shape: bf16[16,128], index: 5, kind: output, shape index: {0}]   ;;  %s776_s6 = inlined_call_operand.hbm [shape: bf16[16,128], index: 6, kind: output, shape index: {1}]  }
   0x1   :  { %13 = vsyncpa [#allocation6], 0 }
   0x2   :  { %14 = vsyncpa [#allocation4], 0 }
   0x3   :  { %15 = vsyncpa [#allocation10], 0  ;;  %s695_s21 = smov [#allocation5]  }
   0x4   :  { %s33_s22 = sshll.u32 %s695_s21, 4  ;;  %s34_s22 = int_to_ptr.vmem [resolvable:$true] %s33_s22 }
   0x5   :  { %s595_s23 = scalar_lea.vmem %s34_s22, 256  ;;  %p600_p1 = scmp.lt.s32.totalorder %s34_s22, %s34_s22 }
   0x6   :  { %p596_p0 = scmp.ne.s32.totalorder %s34_s22, %s595_s23  ;;  %p601_p2 = scmp.lt.s32.totalorder %s595_s23, %s595_s23 }
   0x8   :  { %p602_p3 = por %p601_p2, %p600_p1 }
   0xa   :  { %p603_p4 = pnand %p602_p3, %p596_p0 }
   0xc   :  { %606 = shalt.err (!%p603_p4)
}
   0xd   :  { %s696_s24 = smov 128   ;;  %s697_s25 = smov 8  }
   0xe   :  { %39 = dma.hbm_to_vmem [thread:$0]  %s771_s1, 256, %s34_s22, [#allocation6], %s696_s24, %s696_s24, %s697_s25  }
   0xf   :  { %s698_s28 = smov [#allocation2]  }
  0x10   :  { %s21_s29 = sshll.u32 %s698_s28, 4  ;;  %s22_s29 = int_to_ptr.vmem [resolvable:$true] %s21_s29 }
  0x11   :  { %s615_s30 = scalar_lea.vmem %s22_s29, 128  ;;  %p620_p6 = scmp.lt.s32.totalorder %s22_s29, %s22_s29 }
  0x12   :  { %p616_p5 = scmp.ne.s32.totalorder %s22_s29, %s615_s30  ;;  %p621_p7 = scmp.lt.s32.totalorder %s615_s30, %s615_s30 }
  0x14   :  { %p622_p8 = por %p621_p7, %p620_p6 }
  0x16   :  { %p623_p9 = pnand %p622_p8, %p616_p5 }
  0x18   :  { %626 = shalt.err (!%p623_p9)
}
  0x19   :  { %s699_s7 = smov 64   ;;  %s700_s8 = smov 4  }
  0x1a   :  { %27 = dma.hbm_to_vmem [thread:$0]  %s770_s0, 128, %s22_s29, [#allocation3], %s699_s7, %s699_s7, %s700_s8  }
  0x1b   :  { %s701_s1 = smov [#allocation7]  }
  0x1c   :  { %s47_s11 = sshll.u32 %s701_s1, 4  ;;  %s48_s11 = int_to_ptr.vmem [resolvable:$true] %s47_s11 }
  0x1d   :  { %s635_s12 = scalar_lea.vmem %s48_s11, 4096  ;;  %p640_p11 = scmp.lt.s32.totalorder %s48_s11, %s48_s11 }
  0x1e   :  { %p636_p10 = scmp.ne.s32.totalorder %s48_s11, %s635_s12  ;;  %p641_p12 = scmp.lt.s32.totalorder %s635_s12, %s635_s12 }
  0x20   :  { %p642_p13 = por %p641_p12, %p640_p11 }
  0x22   :  { %p643_p0 = pnand %p642_p13, %p636_p10 }
  0x24   :  { %646 = shalt.err (!%p643_p0)
}
  0x25   :  { %53 = dma.hbm_to_vmem [thread:$0]  %s773_s3, 4096, %s48_s11, [#allocation6], %s696_s24, %s696_s24, %s697_s25  }
  0x26   :  { %687 = dma.done.wait [#allocation3], 128  }
  0x27   :  { %688 = vsyncadd [#allocation3], 4294967168 }
  0x28   :  { %689 = dma.done.wait [#allocation6], 4352  }
  0x29   :  { %690 = vsyncadd [#allocation6], 4294962944  ;;  %v702_v0 = vmov 0   ;;  %v519_v1 = vld [vmem:[#allocation5 + $0x4] ss:$8 sps:$4 sm:$0xff]   ;;  %v522_v3 = vld [vmem:[#allocation2] sm:$0xff]   ;;  %v72_v36 = vlaneseq }
  0x2a   :  { %133 = vmatprep.mubr.bf16.mxu0 %v702_v0  ;;  %v521_v2 = vld [vmem:[#allocation5] ss:$8 sps:$4 sm:$0xff]   ;;  %115 = vmatprep.subr.bf16.mxu0 %v519_v1  ;;  %vm97_vm0 = vcmask 130048   ;;  %v523_v4 = vld [vmem:[#allocation7 + $0x74] ss:$8 sps:$4 sm:$0xff]   ;;  %s703_s16 = smov [#allocation9]  }
  0x2b   :  { %116 = vmatpush1.bf16.msra.mxu0 %v521_v2  ;;  %v525_v5 = vld [vmem:[#allocation7 + $0x70] ss:$8 sps:$4 sm:$0xff]   ;;  %v526_v6 = vld [vmem:[#allocation7 + $0x64] ss:$8 sps:$4 sm:$0xff]   ;;  %354 = vmatprep.subr.bf16.mxu1 %v523_v4  ;;  %v528_v7 = vld [vmem:[#allocation7 + $0x60] ss:$8 sps:$4 sm:$0xff]  }
  0x2c   :  { %355 = vmatpush1.bf16.msra.mxu1 %v525_v5  ;;  %v529_v8 = vld [vmem:[#allocation7 + $0x54] ss:$8 sps:$4 sm:$0xff]   ;;  %v531_v9 = vld [vmem:[#allocation7 + $0x50] ss:$8 sps:$4 sm:$0xff]   ;;  %v532_v10 = vld [vmem:[#allocation7 + $0x44] ss:$8 sps:$4 sm:$0xff]  }
  0x2d   :  { %356 = vmatprep.subr.bf16.mxu1 %v526_v6  ;;  %v534_v11 = vld [vmem:[#allocation7 + $0x40] ss:$8 sps:$4 sm:$0xff]   ;;  %v535_v12 = vld [vmem:[#allocation7 + $0x34] ss:$8 sps:$4 sm:$0xff]   ;;  %v537_v13 = vld [vmem:[#allocation7 + $0x30] ss:$8 sps:$4 sm:$0xff]  }
  0x2e   :  { %458 = vmatmul.mubr.msk.bf16.vlgmr.msra.gmra.mxu0 %vm97_vm0, %v522_v3  ;;  %v538_v14 = vld [vmem:[#allocation7 + $0x24] ss:$8 sps:$4 sm:$0xff]   ;;  %v540_v15 = vld [vmem:[#allocation7 + $0x20] ss:$8 sps:$4 sm:$0xff]   ;;  %v541_v16 = vld [vmem:[#allocation7 + $0x14] ss:$8 sps:$4 sm:$0xff]  }
  0x2f   :  { %v543_v17 = vld [vmem:[#allocation7 + $0x10] ss:$8 sps:$4 sm:$0xff]   ;;  %v544_v18 = vld [vmem:[#allocation7 + $0x4] ss:$8 sps:$4 sm:$0xff]   ;;  %v546_v19 = vld [vmem:[#allocation7] ss:$8 sps:$4 sm:$0xff]  }
  0x30   :  { %357 = vmatpush1.bf16.msra.mxu1 %v528_v7  ;;  %v547_v20 = vld [vmem:[#allocation7 + $0xf4] ss:$8 sps:$4 sm:$0xff]   ;;  %v549_v21 = vld [vmem:[#allocation7 + $0xf0] ss:$8 sps:$4 sm:$0xff]   ;;  %v550_v22 = vld [vmem:[#allocation7 + $0xe4] ss:$8 sps:$4 sm:$0xff]  }
  0x31   :  { %358 = vmatprep.subr.bf16.mxu1 %v529_v8  ;;  %v552_v23 = vld [vmem:[#allocation7 + $0xe0] ss:$8 sps:$4 sm:$0xff]   ;;  %v553_v24 = vld [vmem:[#allocation7 + $0xd4] ss:$8 sps:$4 sm:$0xff]   ;;  %v555_v25 = vld [vmem:[#allocation7 + $0xd0] ss:$8 sps:$4 sm:$0xff]  }
  0x32   :  { %v556_v26 = vld [vmem:[#allocation7 + $0xc4] ss:$8 sps:$4 sm:$0xff]   ;;  %v558_v27 = vld [vmem:[#allocation7 + $0xc0] ss:$8 sps:$4 sm:$0xff]   ;;  %v559_v28 = vld [vmem:[#allocation7 + $0xb4] ss:$8 sps:$4 sm:$0xff]  }
  0x33   :  { %v561_v29 = vld [vmem:[#allocation7 + $0xb0] ss:$8 sps:$4 sm:$0xff]   ;;  %v562_v30 = vld [vmem:[#allocation7 + $0xa4] ss:$8 sps:$4 sm:$0xff]   ;;  %v564_v31 = vld [vmem:[#allocation7 + $0xa0] ss:$8 sps:$4 sm:$0xff]  }
  0x34   :  { %359 = vmatpush1.bf16.msra.mxu1 %v531_v9  ;;  %v565_v32 = vld [vmem:[#allocation7 + $0x94] ss:$8 sps:$4 sm:$0xff]   ;;  %v567_v33 = vld [vmem:[#allocation7 + $0x90] ss:$8 sps:$4 sm:$0xff]   ;;  %v568_v34 = vld [vmem:[#allocation7 + $0x84] ss:$8 sps:$4 sm:$0xff]  }
  0x35   :  { %360 = vmatprep.subr.bf16.mxu1 %v532_v10  ;;  %v570_v35 = vld [vmem:[#allocation7 + $0x80] ss:$8 sps:$4 sm:$0xff]   ;;  %v73_v37 = vshrl.u32 %v72_v36, 7  ;;  %s438_s17 = sshll.u32 %s703_s16, 4  ;;  %s704_s18 = smov [#allocation8]   ;;  %s439_s17 = int_to_ptr.vmem [resolvable:$true] %s438_s17 }
  0x36   :  { %v70_v39 = vld [vmem:[%s772_s2] sm:$0x3]  ;;  %s647_s19 = scalar_lea.vmem %s439_s17, 128  ;;  %p652_p2 = scmp.lt.s32.totalorder %s439_s17, %s439_s17 }
  0x37   :  { %v78_v38 = vsub.s32 1, %v73_v37  ;;  %v74_v40 = vsub.s32 0, %v73_v37  ;;  %v182_v57 = vld [vmem:[%s774_s4] sm:$0x3]  ;;  %s426_s4 = sshll.u32 %s704_s18, 4  ;;  %p648_p1 = scmp.ne.s32.totalorder %s439_s17, %s647_s19  ;;  %s427_s4 = int_to_ptr.vmem [resolvable:$true] %s426_s4 }
  0x38   :  { %361 = vmatpush1.bf16.msra.mxu1 %v534_v11  ;;  %p653_p3 = scmp.lt.s32.totalorder %s647_s19, %s647_s19 }
  0x39   :  { %362 = vmatprep.subr.bf16.mxu1 %v535_v12  ;;  %v79_v41 = vrot.slane %v70_v39, %v78_v38  ;;  %v75_v43 = vrot.slane %v70_v39, %v74_v40  ;;  %v187_v58 = vrot.slane %v182_v57, %v74_v40  ;;  %v191_v60 = vrot.slane %v182_v57, %v78_v38 }
  0x3a   :  { %p654_p4 = por %p653_p3, %p652_p2 }
  0x3c   :  { %363 = vmatpush1.bf16.msra.mxu1 %v537_v13  ;;  %p655_p5 = pnand %p654_p4, %p648_p1 }
  0x3d   :  { %364 = vmatprep.subr.bf16.mxu1 %v538_v14 }
  0x40   :  { %365 = vmatpush1.bf16.msra.mxu1 %v540_v15 }
  0x41   :  { %366 = vmatprep.subr.bf16.mxu1 %v541_v16 }
  0x44   :  { %367 = vmatpush1.bf16.msra.mxu1 %v543_v17 }
  0x45   :  { %368 = vmatprep.subr.bf16.mxu1 %v544_v18 }
  0x48   :  { %369 = vmatpush1.bf16.msra.mxu1 %v546_v19 }
  0x49   :  { %370 = vmatprep.subr.bf16.mxu1 %v547_v20 }
  0x4c   :  { %371 = vmatpush2.bf16.msra.mxu1 %v549_v21 }
  0x4d   :  { %372 = vmatprep.subr.bf16.mxu1 %v550_v22 }
  0x50   :  { %373 = vmatpush2.bf16.msra.mxu1 %v552_v23 }
  0x51   :  { %374 = vmatprep.subr.bf16.mxu1 %v553_v24 }
  0x54   :  { %375 = vmatpush2.bf16.msra.mxu1 %v555_v25 }
  0x55   :  { %376 = vmatprep.subr.bf16.mxu1 %v556_v26 }
  0x58   :  { %377 = vmatpush2.bf16.msra.mxu1 %v558_v27 }
  0x59   :  { %378 = vmatprep.subr.bf16.mxu1 %v559_v28 }
  0x5c   :  { %379 = vmatpush2.bf16.msra.mxu1 %v561_v29 }
  0x5d   :  { %380 = vmatprep.subr.bf16.mxu1 %v562_v30 }
  0x60   :  { %381 = vmatpush2.bf16.msra.mxu1 %v564_v31 }
  0x61   :  { %382 = vmatprep.subr.bf16.mxu1 %v565_v32 }
  0x64   :  { %383 = vmatpush2.bf16.msra.mxu1 %v567_v33 }
  0x65   :  { %384 = vmatprep.subr.bf16.mxu1 %v568_v34 }
  0x68   :  { %385 = vmatpush2.bf16.msra.mxu1 %v570_v35 }
  0xee   :  { %v135_v42 = vpop.f32.mrf.mxu0 }
  0xef   :  { %v136_v48 = vadd.f32 %v135_v42, %v75_v43 }
  0xf0   :  { %v137_v44 = vpop.f32.mrf.mxu0 }
  0xf1   :  { %v138_v45 = vadd.f32 %v137_v44, %v79_v41 }
  0xf2   :  { %v139_v46 = vpop.f32.mrf.mxu0 }
  0xf3   :  { %v140_v47 = vadd.f32 %v139_v46, %v75_v43  ;;  %571 = vtanh.f32 %v138_v45 }
  0xf4   :  { %v141_v49 = vpop.f32.mrf.mxu0 }
  0xf5   :  { %v142_v50 = vadd.f32 %v141_v49, %v79_v41  ;;  %573 = vtanh.f32 %v140_v47 }
  0xf7   :  { %575 = vtanh.f32 %v142_v50 }
  0xf8   :  { %577 = vtanh.f32 %v136_v48 }
 0x100   :  { %v572_v51 = vpop.eup %571 }
 0x102   :  { %v574_v52 = vpop.eup %573 }
 0x104   :  { %v576_v53 = vpop.eup %575 }
 0x105   :  { %v578_v54 = vpop.eup %577  ;;  %v149_v55 = vpack.c.bf16 %v576_v53, %v572_v51 }
 0x106   :  { %v148_v56 = vpack.c.bf16 %v574_v52, %v578_v54 }
 0x107   :  { %386 = vmatprep.mubr.bf16.mxu1 %v149_v55 }
 0x108   :  { %387 = vmatmul.mubr.bf16.vlgmr.msra.gmra.mxu1 %v148_v56 }
 0x1c8   :  { %v388_v59 = vpop.f32.mrf.mxu1 }
 0x1c9   :  { %v389_v61 = vadd.f32 %v388_v59, %v187_v58 }
 0x1ca   :  { %v390_v62 = vpop.f32.mrf.mxu1 }
 0x1cb   :  { %v391_v63 = vadd.f32 %v390_v62, %v191_v60  ;;  %579 = vtanh.f32 %v389_v61 }
 0x1cc   :  { %v392_v0 = vpop.f32.mrf.mxu1 }
 0x1cd   :  { %v393_v1 = vadd.f32 %v392_v0, %v187_v58 }
 0x1ce   :  { %v394_v2 = vpop.f32.mrf.mxu1 }
 0x1cf   :  { %581 = vtanh.f32 %v393_v1  ;;  %v395_v3 = vadd.f32 %v394_v2, %v191_v60 }
 0x1d0   :  { %583 = vtanh.f32 %v391_v63 }
 0x1d1   :  { %585 = vtanh.f32 %v395_v3 }
 0x1d8   :  { %v580_v4 = vpop.eup %579 }
 0x1dc   :  { %v582_v5 = vpop.eup %581 }
 0x1dd   :  { %v584_v6 = vpop.eup %583  ;;  %v502_v7 = vpack.c.bf16 %v582_v5, %v580_v4 }
 0x1de   :  { %v586_v8 = vpop.eup %585 }
 0x1df   :  { %v507_v9 = vpack.c.bf16 %v586_v8, %v584_v6  ;;  %503 = vst [vmem:[#allocation9] sm:$0xff] %v502_v7  }
 0x1e0   :  { %658 = shalt.err (!%p655_p5)
}
 0x1e1   :  { %444 = dma.vmem_to_hbm [thread:$0]  %s439_s17, 128, %s776_s6, [#allocation10], %s699_s7, %s699_s7, %s700_s8   ;;  %508 = vst [vmem:[#allocation8] sm:$0xff] %v507_v9  }
 0x1e2   :  { %s667_s22 = scalar_lea.vmem %s427_s4, 128  ;;  %p672_p7 = scmp.lt.s32.totalorder %s427_s4, %s427_s4 }
 0x1e3   :  { %p668_p6 = scmp.ne.s32.totalorder %s427_s4, %s667_s22  ;;  %p673_p8 = scmp.lt.s32.totalorder %s667_s22, %s667_s22 }
 0x1e5   :  { %p674_p9 = por %p673_p8, %p672_p7 }
 0x1e7   :  { %p675_p10 = pnand %p674_p9, %p668_p6 }
 0x1e9   :  { %678 = shalt.err (!%p675_p10)
}
 0x1ea   :  { %432 = dma.vmem_to_hbm [thread:$0]  %s427_s4, 128, %s775_s5, [#allocation4], %s699_s7, %s699_s7, %s700_s8  }
 0x1eb   :  { %691 = dma.done.wait [#allocation4], 128  }
 0x1ec   :  { %692 = vsyncadd [#allocation4], 4294967168 }
 0x1ed   :  { %693 = dma.done.wait [#allocation10], 128  }
 0x1ee   :  { %694 = vsyncadd [#allocation10], 4294967168 }
 0x1ef   :  { %451 = vsyncpa [#allocation3], 1 }
 0x1f0   :  { %452 = vsyncpa [#allocation6], 1 }
 0x1f1   :  { %453 = vsyncpa [#allocation4], 1 }
 0x1f2   :  { %454 = vsyncpa [#allocation10], 1 }

</bundles_post_ra>
